<compile_context>
chip_gen: v7x
topology: tpu7x:2x2x1
jax: 0.10.0
libtpu: 0.0.40
codegen_flags: <defaults>
</compile_context>

<pallas_src>
import functools

import jax
import jax.numpy as jnp
from jax.experimental import pallas as pl
from jax.experimental.pallas import tpu as pltpu

_LANE = 128


def _round_up(x, m):
    return ((x + m - 1) // m) * m


def _mlp_kernel(x_ref, w1_ref, b1_ref, w2_ref, b2_ref,
                w3_ref, b3_ref, w4_ref, b4_ref, o_ref):
    # Layer 1: bf16 operands, f32 accumulation; bias + ReLU in f32.
    h = jnp.dot(x_ref[...], w1_ref[...], preferred_element_type=jnp.float32)
    h = jnp.maximum(h + b1_ref[...], 0.0).astype(w2_ref.dtype)
    # Layer 2
    h = jnp.dot(h, w2_ref[...], preferred_element_type=jnp.float32)
    h = jnp.maximum(h + b2_ref[...], 0.0).astype(w3_ref.dtype)
    # Layer 3
    h = jnp.dot(h, w3_ref[...], preferred_element_type=jnp.float32)
    h = jnp.maximum(h + b3_ref[...], 0.0).astype(w4_ref.dtype)
    # Layer 4 (no activation)
    out = jnp.dot(h, w4_ref[...], preferred_element_type=jnp.float32) + b4_ref[...]
    o_ref[...] = out.astype(o_ref.dtype)


def _resident_spec(shape):
    """Weight/bias spec: constant index_map, single-buffered (no re-DMA)."""
    try:
        return pl.BlockSpec(shape, lambda i: (0, 0), pipeline_mode=pl.Buffered(1))
    except TypeError:  # older jax without pipeline_mode kwarg
        return pl.BlockSpec(shape, lambda i: (0, 0))


def vector2vector_forward(x, params, *, batch_tile=None,
                          compute_dtype=jnp.bfloat16):
    """Fused 4-layer MLP forward.

    x:      [B, input_dim]
    params: dict of w1 [D,H], b1 [H], w2 [H,H], b2 [H], w3 [H,H], b3 [H],
            w4 [H,O], b4 [O]  (weights stored as [in, out]).
    """
    B, D = x.shape
    H = params["w1"].shape[1]
    O = params["w4"].shape[1]
    out_dtype = x.dtype
    cdt = jnp.dtype(compute_dtype)

    # --- padded (lane-aligned) problem sizes -------------------------------
    Dp = _round_up(D, _LANE)
    Hp = _round_up(H, _LANE)
    Op = _round_up(O, _LANE)

    # Batch tile: multiple of the packed sublane tile, capped so the streamed
    # x/out buffers (double-buffered) stay small next to the resident weights.
    sub = 8 * (4 // cdt.itemsize)            # 8 for f32, 16 for bf16
    if batch_tile is None:
        batch_tile = min(_round_up(B, sub), 256)
    tb = _round_up(batch_tile, sub)
    Bp = _round_up(B, tb)
    grid = Bp // tb

    # --- pad + cast operands (zero padding keeps the math exact) -----------
    xp = jnp.zeros((Bp, Dp), cdt).at[:B, :D].set(x.astype(cdt))

    def pad_w(w, rows, cols):
        return jnp.zeros((rows, cols), cdt).at[:w.shape[0], :w.shape[1]].set(
            w.astype(cdt))

    def pad_b(b, cols):  # biases stay f32 (added onto the f32 accumulator)
        return jnp.zeros((1, cols), jnp.float32).at[0, :b.shape[0]].set(
            b.astype(jnp.float32))

    w1 = pad_w(params["w1"], Dp, Hp); b1 = pad_b(params["b1"], Hp)
    w2 = pad_w(params["w2"], Hp, Hp); b2 = pad_b(params["b2"], Hp)
    w3 = pad_w(params["w3"], Hp, Hp); b3 = pad_b(params["b3"], Hp)
    w4 = pad_w(params["w4"], Hp, Op); b4 = pad_b(params["b4"], Op)

    # --- VMEM budget + cost estimate ---------------------------------------
    weight_bytes = (w1.size + w2.size + w3.size + w4.size) * cdt.itemsize
    bias_bytes = (b1.size + b2.size + b3.size + b4.size) * 4
    out_itemsize = jnp.dtype(out_dtype).itemsize
    stream_bytes = 2 * tb * Dp * cdt.itemsize + 2 * tb * Op * out_itemsize
    scratch_bytes = 4 * tb * Hp * 4          # headroom for f32 intermediates
    vmem_limit = int(min(
        max(weight_bytes + bias_bytes + stream_bytes + scratch_bytes + (4 << 20),
            16 << 20),
        64 << 20))                            # stay under v7x physical VMEM

    flops = 2 * Bp * (Dp * Hp + 2 * Hp * Hp + Hp * Op)
    bytes_accessed = (xp.size * cdt.itemsize + weight_bytes + bias_bytes
                      + Bp * Op * out_itemsize)
    cost = pl.CostEstimate(flops=flops, transcendentals=0,
                           bytes_accessed=bytes_accessed)

    out_padded = pl.pallas_call(
        _mlp_kernel,
        out_shape=jax.ShapeDtypeStruct((Bp, Op), out_dtype),
        grid_spec=pltpu.PrefetchScalarGridSpec(
            num_scalar_prefetch=0,
            grid=(grid,),
            in_specs=[
                pl.BlockSpec((tb, Dp), lambda i: (i, 0)),   # streamed x tile
                _resident_spec((Dp, Hp)), _resident_spec((1, Hp)),  # layer1
                _resident_spec((Hp, Hp)), _resident_spec((1, Hp)),  # layer2
                _resident_spec((Hp, Hp)), _resident_spec((1, Hp)),  # layer3
                _resident_spec((Hp, Op)), _resident_spec((1, Op)),  # layer4
            ],
            out_specs=pl.BlockSpec((tb, Op), lambda i: (i, 0)),     # lane-dense
        ),
        compiler_params=pltpu.CompilerParams(
            dimension_semantics=("parallel",),
            vmem_limit_bytes=vmem_limit),
        cost_estimate=cost,
    )(xp, w1, b1, w2, b2, w3, b3, w4, b4)

    return out_padded[:B, :O]


def init_params(key, input_dim, hidden_dim, output_dim, dtype=jnp.float32):
    """PyTorch-Linear-style uniform init; weights stored as [in_dim, out_dim]."""
    ks = jax.random.split(key, 8)

    def linear(kw, kb, fan_in, fan_out):
        bound = 1.0 / jnp.sqrt(jnp.asarray(fan_in, dtype))
        w = jax.random.uniform(kw, (fan_in, fan_out), dtype, -bound, bound)
        b = jax.random.uniform(kb, (fan_out,), dtype, -bound, bound)
        return w, b

    w1, b1 = linear(ks[0], ks[1], input_dim, hidden_dim)
    w2, b2 = linear(ks[2], ks[3], hidden_dim, hidden_dim)
    w3, b3 = linear(ks[4], ks[5], hidden_dim, hidden_dim)
    w4, b4 = linear(ks[6], ks[7], hidden_dim, output_dim)
    return dict(w1=w1, b1=b1, w2=w2, b2=b2, w3=w3, b3=b3, w4=w4, b4=b4)


def reference_forward(x, p):
    h = jax.nn.relu(x @ p["w1"] + p["b1"])
    h = jax.nn.relu(h @ p["w2"] + p["b2"])
    h = jax.nn.relu(h @ p["w3"] + p["b3"])
    return h @ p["w4"] + p["b4"]


if __name__ == "__main__":
    # Small shapes consistent with the module's forward:
    # x: [batch, input_dim]; hidden_dim; output_dim.
    # (vocab_size / embedding_dim are unused by the forward pass.)
    batch, input_dim, hidden_dim, output_dim = 8, 16, 32, 8

    key = jax.random.PRNGKey(0)
    k_x, k_p = jax.random.split(key)
    x = jax.random.normal(k_x, (batch, input_dim), dtype=jnp.float32)
    params = init_params(k_p, input_dim, hidden_dim, output_dim)

    fwd = jax.jit(functools.partial(vector2vector_forward))
    out = jax.block_until_ready(fwd(x, params))

    ref = reference_forward(x, params)
    assert out.shape == (batch, output_dim)
    # bf16 operands with f32 accumulation -> loosen tolerance vs. f32 reference.
    assert jnp.allclose(out, ref, atol=5e-2, rtol=5e-2), "mismatch vs JAX reference"

    print("KERNEL_OK")
</pallas_src>

<mosaic_0001>
module attributes {stable_mosaic.version = 11 : i64} {
  func.func @_mlp_kernel(%arg0: i32, %arg1: memref<16x128xbf16, #tpu.memory_space<vmem>>, %arg2: memref<128x128xbf16, #tpu.memory_space<vmem>>, %arg3: memref<1x128xf32, #tpu.memory_space<vmem>>, %arg4: memref<128x128xbf16, #tpu.memory_space<vmem>>, %arg5: memref<1x128xf32, #tpu.memory_space<vmem>>, %arg6: memref<128x128xbf16, #tpu.memory_space<vmem>>, %arg7: memref<1x128xf32, #tpu.memory_space<vmem>>, %arg8: memref<128x128xbf16, #tpu.memory_space<vmem>>, %arg9: memref<1x128xf32, #tpu.memory_space<vmem>>, %arg10: memref<16x128xf32, #tpu.memory_space<vmem>>) attributes {dimension_semantics = [#tpu.dimension_semantics<parallel>], iteration_bounds = array<i64: 1>, scalar_prefetch = 0 : i64, scratch_operands = 0 : i64, tpu.core_type = #tpu.core_type<tc>, window_params = [{transform_indices = @transform_0, window_bounds = array<i64: 16, 128>}, {pipeline_mode = #tpu.pipeline_mode<synchronous>, transform_indices = @transform_1, window_bounds = array<i64: 128, 128>}, {pipeline_mode = #tpu.pipeline_mode<synchronous>, transform_indices = @transform_2, window_bounds = array<i64: 1, 128>}, {pipeline_mode = #tpu.pipeline_mode<synchronous>, transform_indices = @transform_3, window_bounds = array<i64: 128, 128>}, {pipeline_mode = #tpu.pipeline_mode<synchronous>, transform_indices = @transform_4, window_bounds = array<i64: 1, 128>}, {pipeline_mode = #tpu.pipeline_mode<synchronous>, transform_indices = @transform_5, window_bounds = array<i64: 128, 128>}, {pipeline_mode = #tpu.pipeline_mode<synchronous>, transform_indices = @transform_6, window_bounds = array<i64: 1, 128>}, {pipeline_mode = #tpu.pipeline_mode<synchronous>, transform_indices = @transform_7, window_bounds = array<i64: 128, 128>}, {pipeline_mode = #tpu.pipeline_mode<synchronous>, transform_indices = @transform_8, window_bounds = array<i64: 1, 128>}, {transform_indices = @transform_9, window_bounds = array<i64: 16, 128>}]} {
    %c0 = arith.constant 0 : index
    %c0_0 = arith.constant 0 : index
    %0 = vector.load %arg1[%c0, %c0_0] : memref<16x128xbf16, #tpu.memory_space<vmem>>, vector<16x128xbf16>
    %c0_1 = arith.constant 0 : index
    %c0_2 = arith.constant 0 : index
    %1 = vector.load %arg2[%c0_1, %c0_2] : memref<128x128xbf16, #tpu.memory_space<vmem>>, vector<128x128xbf16>
    %cst = arith.constant dense<0.000000e+00> : vector<16x128xf32>
    %2 = tpu.matmul %0, %1, %cst {dimension_numbers = #tpu.dot_dimension_numbers<[1], [0], [0], [1], [0, 0, 1, 1], [], []>} : vector<16x128xbf16>, vector<128x128xbf16>, vector<16x128xf32> -> vector<16x128xf32>
    %c0_3 = arith.constant 0 : index
    %c0_4 = arith.constant 0 : index
    %3 = vector.load %arg3[%c0_3, %c0_4] : memref<1x128xf32, #tpu.memory_space<vmem>>, vector<1x128xf32>
    %4 = vector.broadcast %3 : vector<1x128xf32> to vector<16x128xf32>
    %5 = arith.addf %2, %4 : vector<16x128xf32>
    %cst_5 = arith.constant 0.000000e+00 : f32
    %6 = vector.broadcast %cst_5 : f32 to vector<16x128xf32>
    %7 = arith.maximumf %5, %6 : vector<16x128xf32>
    %8 = arith.truncf %7 : vector<16x128xf32> to vector<16x128xbf16>
    %c0_6 = arith.constant 0 : index
    %c0_7 = arith.constant 0 : index
    %9 = vector.load %arg4[%c0_6, %c0_7] : memref<128x128xbf16, #tpu.memory_space<vmem>>, vector<128x128xbf16>
    %cst_8 = arith.constant dense<0.000000e+00> : vector<16x128xf32>
    %10 = tpu.matmul %8, %9, %cst_8 {dimension_numbers = #tpu.dot_dimension_numbers<[1], [0], [0], [1], [0, 0, 1, 1], [], []>} : vector<16x128xbf16>, vector<128x128xbf16>, vector<16x128xf32> -> vector<16x128xf32>
    %c0_9 = arith.constant 0 : index
    %c0_10 = arith.constant 0 : index
    %11 = vector.load %arg5[%c0_9, %c0_10] : memref<1x128xf32, #tpu.memory_space<vmem>>, vector<1x128xf32>
    %12 = vector.broadcast %11 : vector<1x128xf32> to vector<16x128xf32>
    %13 = arith.addf %10, %12 : vector<16x128xf32>
    %cst_11 = arith.constant 0.000000e+00 : f32
    %14 = vector.broadcast %cst_11 : f32 to vector<16x128xf32>
    %15 = arith.maximumf %13, %14 : vector<16x128xf32>
    %16 = arith.truncf %15 : vector<16x128xf32> to vector<16x128xbf16>
    %c0_12 = arith.constant 0 : index
    %c0_13 = arith.constant 0 : index
    %17 = vector.load %arg6[%c0_12, %c0_13] : memref<128x128xbf16, #tpu.memory_space<vmem>>, vector<128x128xbf16>
    %cst_14 = arith.constant dense<0.000000e+00> : vector<16x128xf32>
    %18 = tpu.matmul %16, %17, %cst_14 {dimension_numbers = #tpu.dot_dimension_numbers<[1], [0], [0], [1], [0, 0, 1, 1], [], []>} : vector<16x128xbf16>, vector<128x128xbf16>, vector<16x128xf32> -> vector<16x128xf32>
    %c0_15 = arith.constant 0 : index
    %c0_16 = arith.constant 0 : index
    %19 = vector.load %arg7[%c0_15, %c0_16] : memref<1x128xf32, #tpu.memory_space<vmem>>, vector<1x128xf32>
    %20 = vector.broadcast %19 : vector<1x128xf32> to vector<16x128xf32>
    %21 = arith.addf %18, %20 : vector<16x128xf32>
    %cst_17 = arith.constant 0.000000e+00 : f32
    %22 = vector.broadcast %cst_17 : f32 to vector<16x128xf32>
    %23 = arith.maximumf %21, %22 : vector<16x128xf32>
    %24 = arith.truncf %23 : vector<16x128xf32> to vector<16x128xbf16>
    %c0_18 = arith.constant 0 : index
    %c0_19 = arith.constant 0 : index
    %25 = vector.load %arg8[%c0_18, %c0_19] : memref<128x128xbf16, #tpu.memory_space<vmem>>, vector<128x128xbf16>
    %cst_20 = arith.constant dense<0.000000e+00> : vector<16x128xf32>
    %26 = tpu.matmul %24, %25, %cst_20 {dimension_numbers = #tpu.dot_dimension_numbers<[1], [0], [0], [1], [0, 0, 1, 1], [], []>} : vector<16x128xbf16>, vector<128x128xbf16>, vector<16x128xf32> -> vector<16x128xf32>
    %c0_21 = arith.constant 0 : index
    %c0_22 = arith.constant 0 : index
    %27 = vector.load %arg9[%c0_21, %c0_22] : memref<1x128xf32, #tpu.memory_space<vmem>>, vector<1x128xf32>
    %28 = vector.broadcast %27 : vector<1x128xf32> to vector<16x128xf32>
    %29 = arith.addf %26, %28 : vector<16x128xf32>
    %c0_23 = arith.constant 0 : index
    %c0_24 = arith.constant 0 : index
    %30 = vector.load %arg10[%c0_23, %c0_24] : memref<16x128xf32, #tpu.memory_space<vmem>>, vector<16x128xf32>
    tpu.vector_store %arg10[%c0_23, %c0_24], %29 {strides = array<i32>} : memref<16x128xf32, #tpu.memory_space<vmem>>, vector<16x128xf32>,
    return
  }
  func.func @transform_0(%arg0: i32) -> (i32, i32) {
    %c0_i32 = arith.constant 0 : i32
    %c0_i32_0 = arith.constant 0 : i32
    return %arg0, %c0_i32 : i32, i32
  }
  func.func @transform_1(%arg0: i32) -> (i32, i32) {
    %c0_i32 = arith.constant 0 : i32
    %c0_i32_0 = arith.constant 0 : i32
    %c0_i32_1 = arith.constant 0 : i32
    return %c0_i32, %c0_i32_0 : i32, i32
  }
  func.func @transform_2(%arg0: i32) -> (i32, i32) {
    %c0_i32 = arith.constant 0 : i32
    %c0_i32_0 = arith.constant 0 : i32
    %c0_i32_1 = arith.constant 0 : i32
    return %c0_i32, %c0_i32_0 : i32, i32
  }
  func.func @transform_3(%arg0: i32) -> (i32, i32) {
    %c0_i32 = arith.constant 0 : i32
    %c0_i32_0 = arith.constant 0 : i32
    %c0_i32_1 = arith.constant 0 : i32
    return %c0_i32, %c0_i32_0 : i32, i32
  }
  func.func @transform_4(%arg0: i32) -> (i32, i32) {
    %c0_i32 = arith.constant 0 : i32
    %c0_i32_0 = arith.constant 0 : i32
    %c0_i32_1 = arith.constant 0 : i32
    return %c0_i32, %c0_i32_0 : i32, i32
  }
  func.func @transform_5(%arg0: i32) -> (i32, i32) {
    %c0_i32 = arith.constant 0 : i32
    %c0_i32_0 = arith.constant 0 : i32
    %c0_i32_1 = arith.constant 0 : i32
    return %c0_i32, %c0_i32_0 : i32, i32
  }
  func.func @transform_6(%arg0: i32) -> (i32, i32) {
    %c0_i32 = arith.constant 0 : i32
    %c0_i32_0 = arith.constant 0 : i32
    %c0_i32_1 = arith.constant 0 : i32
    return %c0_i32, %c0_i32_0 : i32, i32
  }
  func.func @transform_7(%arg0: i32) -> (i32, i32) {
    %c0_i32 = arith.constant 0 : i32
    %c0_i32_0 = arith.constant 0 : i32
    %c0_i32_1 = arith.constant 0 : i32
    return %c0_i32, %c0_i32_0 : i32, i32
  }
  func.func @transform_8(%arg0: i32) -> (i32, i32) {
    %c0_i32 = arith.constant 0 : i32
    %c0_i32_0 = arith.constant 0 : i32
    %c0_i32_1 = arith.constant 0 : i32
    return %c0_i32, %c0_i32_0 : i32, i32
  }
  func.func @transform_9(%arg0: i32) -> (i32, i32) {
    %c0_i32 = arith.constant 0 : i32
    %c0_i32_0 = arith.constant 0 : i32
    return %arg0, %c0_i32 : i32, i32
  }
}

</mosaic_0001>

<bundles_post_ra>
// kernel: vector2vector_forward.1
= control target key start
LH: loop header
LB: loop body
LE: loop exit
PB: predicated region body
PF: predicated region fallthrough
CT: control target
= control target key end

     0   :  { %v692_v0 = vmov 0.0   ;;  %vm693_vm0 = vmmov 0   ;;  %s901_s1 = inlined_call_operand.vmem [shape: bf16[128,128], index: 1, kind: input, shape index: {}]   ;;  %s902_s3 = inlined_call_operand.vmem [shape: bf16[128,128], index: 3, kind: input, shape index: {}]   ;;  %s903_s0 = inlined_call_operand.vmem [shape: bf16[16,128], index: 0, kind: input, shape index: {}]   ;;  %s904_s5 = inlined_call_operand.vmem [shape: bf16[128,128], index: 5, kind: input, shape index: {}]   ;;  %s905_s2 = inlined_call_operand.vmem [shape: f32[1,128], index: 2, kind: input, shape index: {}]   ;;  %s906_s7 = inlined_call_operand.vmem [shape: bf16[128,128], index: 7, kind: input, shape index: {}]   ;;  %s907_s4 = inlined_call_operand.vmem [shape: f32[1,128], index: 4, kind: input, shape index: {}]   ;;  %s908_s6 = inlined_call_operand.vmem [shape: f32[1,128], index: 6, kind: input, shape index: {}]   ;;  %s909_s8 = inlined_call_operand.vmem [shape: f32[1,128], index: 8, kind: input, shape index: {}]   ;;  %s910_s9 = inlined_call_operand.vmem [shape: f32[16,128], index: 9, kind: output, shape index: {}]  }
   0x1   :  { %577 = vmatprep.subr.bf16.mxu0 %v692_v0  ;;  %v659_v1 = vld [vmem:[%s901_s1] sm:$0xff]   ;;  %593 = vmatprep.mubr.msk.bf16.mxu0 %vm693_vm0, %v692_v0  ;;  %v660_v2 = vld [vmem:[%s901_s1 + $0x8] sm:$0xff]   ;;  %v661_v3 = vld [vmem:[%s901_s1 + $0x10] sm:$0xff]  }
   0x2   :  { %597 = vmatprep.subr.bf16.mxu1 %v692_v0  ;;  %613 = vmatprep.mubr.msk.bf16.mxu1 %vm693_vm0, %v692_v0  ;;  %v668_v4 = vld [vmem:[%s902_s3] sm:$0xff]   ;;  %v662_v5 = vld [vmem:[%s901_s1 + $0x18] sm:$0xff]   ;;  %v669_v6 = vld [vmem:[%s902_s3 + $0x8] sm:$0xff]  }
   0x3   :  { %578 = vmatpush3.bf16.msra.mxu0 %v659_v1  ;;  %598 = vmatpush3.bf16.msra.mxu1 %v668_v4  ;;  %v663_v7 = vld [vmem:[%s901_s1 + $0x20] sm:$0xff]   ;;  %v670_v8 = vld [vmem:[%s902_s3 + $0x10] sm:$0xff]   ;;  %v664_v9 = vld [vmem:[%s901_s1 + $0x28] sm:$0xff]  }
   0x4   :  { %579 = vmatprep.subr.bf16.mxu0 %v692_v0  ;;  %599 = vmatprep.subr.bf16.mxu1 %v692_v0  ;;  %v671_v10 = vld [vmem:[%s902_s3 + $0x18] sm:$0xff]   ;;  %v665_v11 = vld [vmem:[%s901_s1 + $0x30] sm:$0xff]   ;;  %v672_v12 = vld [vmem:[%s902_s3 + $0x20] sm:$0xff]  }
   0x5   :  { %v666_v13 = vld [vmem:[%s901_s1 + $0x38] sm:$0xff]   ;;  %v673_v14 = vld [vmem:[%s902_s3 + $0x28] sm:$0xff]   ;;  %v667_v15 = vld [vmem:[%s903_s0] sm:$0xff]  }
   0x6   :  { %v674_v16 = vld [vmem:[%s902_s3 + $0x30] sm:$0xff]   ;;  %v675_v17 = vld [vmem:[%s902_s3 + $0x38] sm:$0xff]   ;;  %v676_v18 = vld [vmem:[%s904_s5] sm:$0xff]  }
   0x7   :  { %580 = vmatpush3.bf16.msra.mxu0 %v660_v2  ;;  %600 = vmatpush3.bf16.msra.mxu1 %v669_v6  ;;  %v677_v19 = vld [vmem:[%s904_s5 + $0x8] sm:$0xff]   ;;  %v678_v20 = vld [vmem:[%s904_s5 + $0x10] sm:$0xff]   ;;  %v679_v21 = vld [vmem:[%s904_s5 + $0x18] sm:$0xff]  }
   0x8   :  { %581 = vmatprep.subr.bf16.mxu0 %v692_v0  ;;  %601 = vmatprep.subr.bf16.mxu1 %v692_v0  ;;  %v680_v22 = vld [vmem:[%s904_s5 + $0x20] sm:$0xff]   ;;  %v681_v23 = vld [vmem:[%s904_s5 + $0x28] sm:$0xff]   ;;  %v682_v34 = vld [vmem:[%s904_s5 + $0x30] sm:$0xff]  }
   0x9   :  { %v504_v24 = vld [vmem:[%s905_s2] ss:$0 sm:$0xff]  ;;  %v683_v35 = vld [vmem:[%s904_s5 + $0x38] sm:$0xff]   ;;  %v685_v37 = vld [vmem:[%s906_s7 + $0x8] sm:$0xff]  }
   0xa   :  { %v684_v36 = vld [vmem:[%s906_s7] sm:$0xff]   ;;  %v686_v38 = vld [vmem:[%s906_s7 + $0x10] sm:$0xff]   ;;  %v687_v39 = vld [vmem:[%s906_s7 + $0x18] sm:$0xff]  }
   0xb   :  { %582 = vmatpush3.bf16.msra.mxu0 %v661_v3  ;;  %602 = vmatpush3.bf16.msra.mxu1 %v670_v8  ;;  %v688_v40 = vld [vmem:[%s906_s7 + $0x20] sm:$0xff]   ;;  %v689_v41 = vld [vmem:[%s906_s7 + $0x28] sm:$0xff]   ;;  %v690_v52 = vld [vmem:[%s906_s7 + $0x30] sm:$0xff]  }
   0xc   :  { %583 = vmatprep.subr.bf16.mxu0 %v692_v0  ;;  %603 = vmatprep.subr.bf16.mxu1 %v692_v0  ;;  %v514_v42 = vld [vmem:[%s907_s4] ss:$0 sm:$0xff]  ;;  %v691_v53 = vld [vmem:[%s906_s7 + $0x38] sm:$0xff]  }
   0xd   :  { %v523_v54 = vld [vmem:[%s908_s6] ss:$0 sm:$0xff] }
   0xf   :  { %584 = vmatpush3.bf16.msra.mxu0 %v662_v5  ;;  %604 = vmatpush3.bf16.msra.mxu1 %v671_v10 }
  0x10   :  { %585 = vmatprep.subr.bf16.mxu0 %v692_v0  ;;  %605 = vmatprep.subr.bf16.mxu1 %v692_v0 }
  0x13   :  { %586 = vmatpush3.bf16.msra.mxu0 %v663_v7  ;;  %606 = vmatpush3.bf16.msra.mxu1 %v672_v12 }
  0x14   :  { %587 = vmatprep.subr.bf16.mxu0 %v692_v0  ;;  %607 = vmatprep.subr.bf16.mxu1 %v692_v0 }
  0x17   :  { %588 = vmatpush3.bf16.msra.mxu0 %v664_v9  ;;  %608 = vmatpush3.bf16.msra.mxu1 %v673_v14 }
  0x18   :  { %589 = vmatprep.subr.bf16.mxu0 %v692_v0  ;;  %609 = vmatprep.subr.bf16.mxu1 %v692_v0 }
  0x1b   :  { %590 = vmatpush3.bf16.msra.mxu0 %v665_v11  ;;  %610 = vmatpush3.bf16.msra.mxu1 %v674_v16 }
  0x1c   :  { %591 = vmatprep.subr.bf16.mxu0 %v692_v0  ;;  %611 = vmatprep.subr.bf16.mxu1 %v692_v0 }
  0x1f   :  { %592 = vmatpush3.bf16.msra.mxu0 %v666_v13  ;;  %612 = vmatpush3.bf16.msra.mxu1 %v675_v17 }
  0x20   :  { %617 = vmatprep.subr.bf16.mxu0 %v692_v0  ;;  %637 = vmatprep.subr.bf16.mxu1 %v692_v0 }
  0x22   :  { %594 = vmatmul.mubr.bf16.vlgmr.msra.gmra.mrb[0].mxu0 %v667_v15 }
  0x23   :  { %633 = vmatprep.mubr.msk.bf16.mxu0 %vm693_vm0, %v692_v0  ;;  %618 = vmatpush3.bf16.msra.mxu0 %v676_v18 }
  0x24   :  { %619 = vmatprep.subr.bf16.mxu0 %v692_v0 }
  0x27   :  { %620 = vmatpush3.bf16.msra.mxu0 %v677_v19 }
  0x28   :  { %621 = vmatprep.subr.bf16.mxu0 %v692_v0 }
  0x2b   :  { %622 = vmatpush3.bf16.msra.mxu0 %v678_v20 }
  0x2c   :  { %623 = vmatprep.subr.bf16.mxu0 %v692_v0 }
  0x2f   :  { %624 = vmatpush3.bf16.msra.mxu0 %v679_v21 }
  0x30   :  { %625 = vmatprep.subr.bf16.mxu0 %v692_v0 }
  0x33   :  { %626 = vmatpush3.bf16.msra.mxu0 %v680_v22 }
  0x34   :  { %627 = vmatprep.subr.bf16.mxu0 %v692_v0 }
  0x37   :  { %628 = vmatpush3.bf16.msra.mxu0 %v681_v23 }
  0x38   :  { %629 = vmatprep.subr.bf16.mxu0 %v692_v0 }
  0x3b   :  { %630 = vmatpush3.bf16.msra.mxu0 %v682_v34 }
  0x3c   :  { %631 = vmatprep.subr.bf16.mxu0 %v692_v0 }
  0x3f   :  { %632 = vmatpush3.bf16.msra.mxu0 %v683_v35 }
  0xf5   :  { %v146_v25 = vpop.f32.mrb[0].mxu0 }
  0xf6   :  { %v147_v26 = vadd.f32 %v504_v24, %v146_v25  ;;  %v595_v27 = vpop.f32.mrb[1].mxu0 }
  0xf7   :  { %v149_v28 = vpop.f32.mrb[2].mxu0 }
  0xf8   :  { %v150_v29 = vadd.f32 %v504_v24, %v149_v28  ;;  %v596_v30 = vpop.f32.mrb[3].mxu0  ;;  %v153_v31 = vmax.f32 %v147_v26, 0.0 }
  0xfa   :  { %v154_v32 = vmax.f32 %v150_v29, 0.0 }
  0xfc   :  { %v155_v33 = vpack.c.bf16 %v154_v32, %v153_v31 }
  0xfe   :  { %614 = vmatmul.mubr.bf16.vlgmr.msra.gmra.mrb[0].mxu1 %v155_v33 }
  0xff   :  { %653 = vmatprep.mubr.msk.bf16.mxu1 %vm693_vm0, %v692_v0  ;;  %638 = vmatpush3.bf16.msra.mxu1 %v684_v36 }
 0x100   :  { %639 = vmatprep.subr.bf16.mxu1 %v692_v0 }
 0x103   :  { %640 = vmatpush3.bf16.msra.mxu1 %v685_v37 }
 0x104   :  { %641 = vmatprep.subr.bf16.mxu1 %v692_v0 }
 0x107   :  { %642 = vmatpush3.bf16.msra.mxu1 %v686_v38 }
 0x108   :  { %643 = vmatprep.subr.bf16.mxu1 %v692_v0 }
 0x10b   :  { %644 = vmatpush3.bf16.msra.mxu1 %v687_v39 }
 0x10c   :  { %645 = vmatprep.subr.bf16.mxu1 %v692_v0 }
 0x10f   :  { %646 = vmatpush3.bf16.msra.mxu1 %v688_v40 }
 0x110   :  { %647 = vmatprep.subr.bf16.mxu1 %v692_v0 }
 0x113   :  { %648 = vmatpush3.bf16.msra.mxu1 %v689_v41 }
 0x114   :  { %649 = vmatprep.subr.bf16.mxu1 %v692_v0 }
 0x117   :  { %650 = vmatpush3.bf16.msra.mxu1 %v690_v52 }
 0x118   :  { %651 = vmatprep.subr.bf16.mxu1 %v692_v0  ;;  %v532_v0 = vld [vmem:[%s909_s8] ss:$0 sm:$0xff] }
 0x11b   :  { %652 = vmatpush3.bf16.msra.mxu1 %v691_v53 }
 0x1d1   :  { %v261_v43 = vpop.f32.mrb[0].mxu1 }
 0x1d2   :  { %v262_v44 = vadd.f32 %v514_v42, %v261_v43  ;;  %v615_v45 = vpop.f32.mrb[1].mxu1 }
 0x1d3   :  { %v264_v46 = vpop.f32.mrb[2].mxu1 }
 0x1d4   :  { %v265_v47 = vadd.f32 %v514_v42, %v264_v46  ;;  %v616_v48 = vpop.f32.mrb[3].mxu1  ;;  %v268_v49 = vmax.f32 %v262_v44, 0.0 }
 0x1d6   :  { %v269_v50 = vmax.f32 %v265_v47, 0.0 }
 0x1d8   :  { %v270_v51 = vpack.c.bf16 %v269_v50, %v268_v49 }
 0x1da   :  { %634 = vmatmul.mubr.bf16.vlgmr.msra.gmra.mrb[4].mxu0 %v270_v51 }
 0x2ad   :  { %v376_v55 = vpop.f32.mrb[4].mxu0 }
 0x2ae   :  { %v377_v56 = vadd.f32 %v523_v54, %v376_v55  ;;  %v635_v57 = vpop.f32.mrb[5].mxu0 }
 0x2af   :  { %v379_v58 = vpop.f32.mrb[6].mxu0 }
 0x2b0   :  { %v380_v59 = vadd.f32 %v523_v54, %v379_v58  ;;  %v636_v60 = vpop.f32.mrb[7].mxu0  ;;  %v383_v61 = vmax.f32 %v377_v56, 0.0 }
 0x2b2   :  { %v384_v62 = vmax.f32 %v380_v59, 0.0 }
 0x2b4   :  { %v385_v63 = vpack.c.bf16 %v384_v62, %v383_v61 }
 0x2b6   :  { %654 = vmatmul.mubr.bf16.vlgmr.msra.gmra.mrb[4].mxu1 %v385_v63 }
 0x389   :  { %v491_v1 = vpop.f32.mrb[4].mxu1 }
 0x38a   :  { %v492_v2 = vadd.f32 %v532_v0, %v491_v1  ;;  %v655_v3 = vpop.f32.mrb[5].mxu1 }
 0x38b   :  { %v494_v4 = vpop.f32.mrb[6].mxu1 }
 0x38c   :  { %498 = vst [vmem:[%s910_s9] sm:$0xff] %v492_v2  ;;  %v495_v5 = vadd.f32 %v532_v0, %v494_v4  ;;  %v656_v6 = vpop.f32.mrb[7].mxu1 }
 0x38e   :  { %499 = vst [vmem:[%s910_s9 + $0x8] sm:$0xff] %v495_v5 }

</bundles_post_ra>
